<compile_context>
chip_gen: v7x
topology: tpu7x:2x2x1
jax: 0.10.0
libtpu: 0.0.40
codegen_flags: <defaults>
</compile_context>

<pallas_src>
import functools

import numpy as np

import jax
import jax.numpy as jnp
from jax.experimental import pallas as pl
from jax.experimental.pallas import tpu as pltpu


def _round_up(x, m):
    return ((x + m - 1) // m) * m


def _cdiv(a, b):
    return (a + b - 1) // b


@functools.lru_cache(maxsize=1)
def _chip_limits():
    """Return (batch-tile cap, vmem_limit_bytes) for the local TPU generation."""
    try:
        vmem_bytes = int(pltpu.get_tpu_info().vmem_capacity_bytes)
    except Exception:
        vmem_bytes = 64 * 1024 * 1024  # conservative: assume v7x-class (64 MiB/TC)
    if vmem_bytes >= 128 * 1024 * 1024:
        # v5e / v6e: 128 MiB physical VMEM -> big tiles amortize per-step overhead.
        return 4096, 64 * 1024 * 1024
    # v7x (64 MiB per TensorCore) or unknown: stay well under the limit.
    # tm=2048 -> ~17 MiB total double-buffered footprint.
    return 2048, 32 * 1024 * 1024


def _decode_kernel(feat_ref, wcomb_ref, bcomb_ref, out_ref):
    # feat_ref  : [TM, F]   VMEM (one batch tile)
    # wcomb_ref : [F, TS]   VMEM (one output-column block of the folded weights)
    # bcomb_ref : [1, TS]   VMEM (matching bias block)
    # out_ref   : [TM, TS]  VMEM
    out = jnp.dot(feat_ref[...], wcomb_ref[...],
                  preferred_element_type=jnp.float32) + bcomb_ref[...]
    out_ref[...] = out.astype(out_ref.dtype)


def prepare_invcrf_decode_params(w_linear, b_linear, hinv, g0,
                                 *, param_dtype=jnp.float32):
    """One-time fold of Linear + PCA-basis decode into a single affine map.

    w_linear: [11, F]; b_linear: [11]; hinv: [1024, 11]; g0: [1024]
    Returns (w_comb [F, 1024] in param_dtype, b_comb [1, 1024] f32).
    The fold is done in f32 and only the result is cast (precision-safe).
    """
    w32 = w_linear.astype(jnp.float32)
    h32 = hinv.astype(jnp.float32)
    w_comb = jnp.matmul(w32.T, h32.T)                                   # [F, 1024]
    b_comb = (b_linear.astype(jnp.float32) @ h32.T
              + g0.astype(jnp.float32)).reshape(1, -1)                  # [1, 1024]
    return w_comb.astype(param_dtype), b_comb.astype(jnp.float32)


@functools.partial(jax.jit,
                   static_argnames=("tm", "ts", "vmem_limit", "out_dtype"))
def _decode_call(feature, w_comb, b_comb, *, tm, ts, vmem_limit, out_dtype):
    b_pad, F = feature.shape
    S = w_comb.shape[1]
    grid_b = b_pad // tm
    grid_s = S // ts

    out_isz = np.dtype(out_dtype).itemsize
    bytes_accessed = (grid_s * b_pad * F * feature.dtype.itemsize   # feature per S-block
                      + grid_b * F * S * w_comb.dtype.itemsize      # weights per B-tile
                      + grid_b * S * b_comb.dtype.itemsize          # bias per B-tile
                      + b_pad * S * out_isz)                        # output writeback

    return pl.pallas_call(
        _decode_kernel,
        out_shape=jax.ShapeDtypeStruct((b_pad, S), out_dtype),
        grid_spec=pltpu.PrefetchScalarGridSpec(
            num_scalar_prefetch=0,
            grid=(grid_b, grid_s),
            in_specs=[
                pl.BlockSpec((tm, F), lambda i, j: (i, 0)),   # batch tile
                pl.BlockSpec((F, ts), lambda i, j: (0, j)),   # weight column block
                pl.BlockSpec((1, ts), lambda i, j: (0, j)),   # bias column block
            ],
            out_specs=pl.BlockSpec((tm, ts), lambda i, j: (i, j)),
        ),
        compiler_params=pltpu.CompilerParams(
            dimension_semantics=("parallel", "parallel"),   # shards over TCs on v7x
            vmem_limit_bytes=vmem_limit,
        ),
        cost_estimate=pl.CostEstimate(
            flops=2 * b_pad * F * S,
            transcendentals=0,
            bytes_accessed=bytes_accessed,
        ),
    )(feature, w_comb, b_comb)


def ae_invcrf_decode(feature, w_comb, b_comb, *, out_dtype=jnp.float32, tm=None):
    """feature: [B, F]; w_comb: [F, 1024]; b_comb: [1, 1024] -> [B, 1024]."""
    B, F = feature.shape
    S = w_comb.shape[1]
    cap, vmem_limit = _chip_limits()

    # Adaptive batch tile: minimize padding waste, multiple of 8, <= chip cap.
    if tm is None:
        n_tiles = max(1, _cdiv(B, cap))
        tm = min(cap, _round_up(_cdiv(B, n_tiles), 8))
    else:
        tm = min(_round_up(tm, 8), max(8, _round_up(B, 8)), cap)

    b_pad = _round_up(B, tm)
    if b_pad != B:
        feature = jnp.pad(feature, ((0, b_pad - B), (0, 0)))
    grid_b = b_pad // tm

    # Match feature dtype to the (possibly bf16) folded weights; f32 accumulate
    # is preserved via preferred_element_type in the kernel.
    if w_comb.dtype != feature.dtype:
        feature = feature.astype(w_comb.dtype)

    # With a single batch tile, split S into 2 lane-dense blocks of 512 so both
    # v7x TensorCores get a grid step (harmless on v5e/v6e: 1 TC).
    ts = 512 if (grid_b < 2 and S % 512 == 0 and S > 512) else S

    out = _decode_call(feature, w_comb, b_comb,
                       tm=tm, ts=ts, vmem_limit=vmem_limit, out_dtype=out_dtype)
    # NOTE: padded rows (B..b_pad) hold b_comb, not zeros; slice before any use.
    return out[:B]


if __name__ == "__main__":
    B, F = 2, 32          # small batch, small feature dim
    S, N_P = 1024, 12     # module constants: s=1024, n_p=12 -> 11 PCA coeffs

    key = jax.random.PRNGKey(0)
    k_feat, k_w, k_b, k_hinv = jax.random.split(key, 4)

    feature = jax.random.normal(k_feat, (B, F), dtype=jnp.float32)

    # Deterministic "Linear(F, 11)" parameters (PyTorch-style uniform scale).
    bound = 1.0 / jnp.sqrt(jnp.float32(F))
    w_linear = jax.random.uniform(k_w, (N_P - 1, F), minval=-bound, maxval=bound,
                                  dtype=jnp.float32)
    b_linear = jax.random.uniform(k_b, (N_P - 1,), minval=-bound, maxval=bound,
                                  dtype=jnp.float32)

    # Deterministic synthetic EMoR basis: mean curve g0 and 11 PCA components.
    g0 = jnp.linspace(0.0, 1.0, S, dtype=jnp.float32)                          # [1024]
    hinv = 0.01 * jax.random.normal(k_hinv, (S, N_P - 1), dtype=jnp.float32)   # [1024, 11]

    # One-time parameter fold (hoisted out of the per-call path). For large-B
    # deployments pass param_dtype=jnp.bfloat16 and out_dtype=jnp.bfloat16 to
    # roughly halve HBM traffic; kept f32 here for the 1e-5 reference check.
    w_comb, b_comb = prepare_invcrf_decode_params(w_linear, b_linear, hinv, g0)

    out = ae_invcrf_decode(feature, w_comb, b_comb)
    out = jax.block_until_ready(out)

    # Pure-JAX reference of the ORIGINAL (unfolded) math.
    w_ref = feature @ w_linear.T + b_linear
    ref = g0[None, :] + w_ref @ hinv.T
    assert out.shape == (B, S)
    assert jnp.allclose(out, ref, atol=1e-5, rtol=1e-5)

    print("KERNEL_OK")
</pallas_src>

<mosaic_0001>
module attributes {stable_mosaic.version = 11 : i64} {
  func.func @_decode_kernel(%arg0: i32, %arg1: i32, %arg2: memref<8x32xf32, #tpu.memory_space<vmem>>, %arg3: memref<32x512xf32, #tpu.memory_space<vmem>>, %arg4: memref<1x512xf32, #tpu.memory_space<vmem>>, %arg5: memref<8x512xf32, #tpu.memory_space<vmem>>) attributes {dimension_semantics = [#tpu.dimension_semantics<parallel>, #tpu.dimension_semantics<parallel>], iteration_bounds = array<i64: 1, 2>, scalar_prefetch = 0 : i64, scratch_operands = 0 : i64, tpu.core_type = #tpu.core_type<tc>, window_params = [{transform_indices = @transform_0, window_bounds = array<i64: 8, 32>}, {transform_indices = @transform_1, window_bounds = array<i64: 32, 512>}, {transform_indices = @transform_2, window_bounds = array<i64: 1, 512>}, {transform_indices = @transform_3, window_bounds = array<i64: 8, 512>}]} {
    %c0 = arith.constant 0 : index
    %c0_0 = arith.constant 0 : index
    %0 = vector.load %arg2[%c0, %c0_0] : memref<8x32xf32, #tpu.memory_space<vmem>>, vector<8x32xf32>
    %c0_1 = arith.constant 0 : index
    %c0_2 = arith.constant 0 : index
    %1 = vector.load %arg3[%c0_1, %c0_2] : memref<32x512xf32, #tpu.memory_space<vmem>>, vector<32x512xf32>
    %cst = arith.constant dense<0.000000e+00> : vector<8x512xf32>
    %2 = tpu.matmul %0, %1, %cst {dimension_numbers = #tpu.dot_dimension_numbers<[1], [0], [0], [1], [0, 0, 1, 1], [], []>} : vector<8x32xf32>, vector<32x512xf32>, vector<8x512xf32> -> vector<8x512xf32>
    %c0_3 = arith.constant 0 : index
    %c0_4 = arith.constant 0 : index
    %3 = vector.load %arg4[%c0_3, %c0_4] : memref<1x512xf32, #tpu.memory_space<vmem>>, vector<1x512xf32>
    %4 = vector.broadcast %3 : vector<1x512xf32> to vector<8x512xf32>
    %5 = arith.addf %2, %4 : vector<8x512xf32>
    %c0_5 = arith.constant 0 : index
    %c0_6 = arith.constant 0 : index
    %6 = vector.load %arg5[%c0_5, %c0_6] : memref<8x512xf32, #tpu.memory_space<vmem>>, vector<8x512xf32>
    tpu.vector_store %arg5[%c0_5, %c0_6], %5 {strides = array<i32>} : memref<8x512xf32, #tpu.memory_space<vmem>>, vector<8x512xf32>,
    return
  }
  func.func @transform_0(%arg0: i32, %arg1: i32) -> (i32, i32) {
    %c0_i32 = arith.constant 0 : i32
    %c0_i32_0 = arith.constant 0 : i32
    return %arg0, %c0_i32 : i32, i32
  }
  func.func @transform_1(%arg0: i32, %arg1: i32) -> (i32, i32) {
    %c0_i32 = arith.constant 0 : i32
    %c0_i32_0 = arith.constant 0 : i32
    return %c0_i32, %arg1 : i32, i32
  }
  func.func @transform_2(%arg0: i32, %arg1: i32) -> (i32, i32) {
    %c0_i32 = arith.constant 0 : i32
    %c0_i32_0 = arith.constant 0 : i32
    return %c0_i32, %arg1 : i32, i32
  }
  func.func @transform_3(%arg0: i32, %arg1: i32) -> (i32, i32) {
    %c0_i32 = arith.constant 0 : i32
    return %arg0, %arg1 : i32, i32
  }
}

</mosaic_0001>

<bundles_post_ra>
// kernel: _decode_call.1
= control target key start
LH: loop header
LB: loop body
LE: loop exit
PB: predicated region body
PF: predicated region fallthrough
CT: control target
= control target key end

     0   :  { %s1179_s0 = inlined_call_operand.hbm [shape: f32[8,32], index: 0, kind: input, shape index: {}]   ;;  %s1180_s1 = inlined_call_operand.hbm [shape: f32[32,1024], index: 1, kind: input, shape index: {}]   ;;  %s1181_s2 = inlined_call_operand.hbm [shape: f32[1,1024], index: 2, kind: input, shape index: {}]   ;;  %s1182_s3 = inlined_call_operand.hbm [shape: f32[8,1024], index: 3, kind: output, shape index: {}]  }
   0x1   :  { %1188 = sst [smem:[#allocation12_spill]] %s1180_s1 }
   0x2   :  { %8 = vsyncpa [#allocation3], 0 }
   0x3   :  { %9 = vsyncpa [#allocation6], 0 }
   0x4   :  { %11 = vsyncpa [#allocation6 + $0x1], 0 }
   0x5   :  { %12 = vsyncpa [#allocation4], 0 }
   0x6   :  { %14 = vsyncpa [#allocation4 + $0x1], 0  ;;  %s910_s12 = smov 0   ;;  %s912_s13 = smov 0  }
   0x7   :  { %s914_s14 = smov 0   ;;  %s916_s15 = smov 0  }
   0x8   :  { %s918_s16 = smov 0   ;;  %s920_s17 = smov 0  }
   0x9 LB: > { %s29_s18 = sadd.s32 1, %s876_s16  ;;  %s65_s19 = sadd.s32 1, %s868_s14  ;;  %s880_s17 = sphi %s920_s17, %s20_s17   ;;  %s876_s16 = sphi %s918_s16, %s1208_s16   ;;  %s872_s15 = sphi %s916_s15, %s1207_s15   ;;  %s868_s14 = sphi %s914_s14, %s1206_s14   ;;  %s864_s13 = sphi %s912_s13, %s1205_s13   ;;  %s860_s12 = sphi %s910_s12, %s1204_s12  }
   0xa   : > { %p30_p0 = scmp.ge.s32.totalorder %s29_s18, 2  ;;  %p72_p1 = scmp.ne.s32.totalorder %s868_s14, %s864_s13 }
   0xb   : > { %p73_p2 = scmp.eq.s32.totalorder %s880_s17, 0  ;;  %p650_p5 = scmp.lt.s32.totalorder %s880_s17, 2 }
   0xc   : > { %s1210_s18 = smov (%p30_p0, %s29_s18), 0  ;;  %s169_s21 = sand.u32 1, %s880_s17  }
   0xd   : > { %p74_p4 = por %p73_p2, %p72_p1  ;;  %s62_s20 = ssub.s32 %s876_s16, %s1210_s18 }
   0xe   : > { %p63_p6 = scmp.eq.s32.totalorder %s62_s20, 0  ;;  %s171_s22 = sand.u32 1, %s868_s14  }
   0xf   : > { %s605_s23 = sshll.u32 %s876_s16, 9  ;;  %s587_s25 = sshll.u32 %s171_s22, 7 }
  0x10   : > { %s958_s24 = scalar_select %p63_p6, %s868_s14, %s65_s19  }
  0x11   : > { %s1189_s1 = sld [smem:[#allocation12_spill]]  ;;  %p967_p7 = pnand %p650_p5, %p74_p4 }
  0x12   : > { %s173_s30 = scalar_lea.vmem [#allocation5], %s587_s25  ;;  %s973_s5 = scalar_lea.sflag [#allocation6], %s169_s21 }
  0x13   : > { %s180_s4 = sshll.u32 %s173_s30, 4  ;;  %p708_p9 = pneg %p967_p7  ;;  %s971_s4 = int_to_ptr.vmem [resolvable:$true] %s180_s4 }
  0x17   : > { %s965_s28 = scalar_lea.hbm %s1189_s1, %s605_s23  ;;  %s711_s9 = scalar_lea.hbm %s1189_s1, 4096 }
  0x18   : > { %s706_s6 = scalar_lea.hbm %s965_s28, 2048  ;;  %p712_p12 = scmp.lt.u32.totalorder %s965_s28, %s1189_s1 }
  0x19   : > { %p707_p8 = scmp.ne.s32.totalorder %s965_s28, %s706_s6  ;;  %p713_p13 = scmp.lt.u32.totalorder %s711_s9, %s706_s6 }
  0x1a   : > { %p715_p2 = scmp.lt.u32.totalorder %s706_s6, %s965_s28 }
  0x1b   : > { %p709_p10 = pnand %p708_p9, %p707_p8  ;;  %p714_p0 = por %p713_p13, %p712_p12 }
  0x1d   : > { %p710_p11 = pneg %p709_p10  ;;  %p716_p4 = por %p715_p2, %p714_p0 }
  0x1f   : > { %p717_p5 = pnand %p716_p4, %p710_p11 }
  0x21   : > { %720 = shalt.err (!%p717_p5)
}
  0x22   : > { %s721_s19 = scalar_lea.vmem %s971_s4, 2048  ;;  %s882_s20 = smov [#allocation5]  }
  0x23   : > { %p722_p6 = scmp.ne.s32.totalorder %s971_s4, %s721_s19  ;;  %s726_s21 = sshll.u32 %s882_s20, 4  ;;  %s727_s21 = int_to_ptr.vmem [resolvable:$false] %s726_s21 }
  0x24   : > { %s728_s23 = scalar_lea.vmem %s727_s21, 4096  ;;  %p729_p3 = scmp.lt.s32.totalorder %s971_s4, %s727_s21 }
  0x25   : > { %p724_p8 = pnand %p722_p6, %p708_p9  ;;  %p730_p12 = scmp.lt.s32.totalorder %s728_s23, %s721_s19 }
  0x27   : > { %p725_p10 = pneg %p724_p8  ;;  %p731_p13 = por %p730_p12, %p729_p3 }
  0x29   : > { %p732_p0 = pnand %p731_p13, %p725_p10 }
  0x2b   : > { %735 = shalt.err (!%p732_p0)
}
  0x2c   : > { %s883_s25 = smov 1024   ;;  %s884_s26 = smov 512  }
  0x2d   : > { %s885_s27 = smov 32   ;;  %s1002_s30 = sadd.s32 4294967295, %s880_s17  }
  0x2e   : > { %641 = dma.hbm_to_vmem [thread:$0]  (!%p967_p7), %s965_s28, 2048, %s971_s4, %s973_s5, %s883_s25, %s884_s26, %s885_s27  }
  0x2f   : > { %s583_s6 = sadd.s32 4294967294, %s880_s17   ;;  %p78_p3 = scmp.ne.s32.totalorder %s864_s13, %s860_s12 }
  0x30   : > { %p1183_p11 = scmp.eq.s32.totalorder %s1002_s30, 0  ;;  %p130_p2 = scmp.eq.s32.totalorder %s1002_s30, 1 }
  0x31   : > { %p136_p4 = scmp.eq.s32.totalorder %s583_s6, 1  ;;  %p584_p6 = scmp.ge.s32.totalorder %s880_s17, 1 }
  0x32   : > { %p1011_p5 = por %p1183_p11, %p78_p3  ;;  %p1019_p8 = por %p130_p2, %p72_p1 }
  0x33   : > { %p1023_p10 = por %p136_p4, %p78_p3  ;;  %p143_p12 = scmp.lt.s32.totalorder %s880_s17, 3 }
  0x34   : > { %s1191_s7 = scalar_select %p1011_p5, 1, 0 }
  0x35   : > { %s1192_s28 = scalar_select %p1019_p8, 1, 0 }
  0x36   : > { %s1193_s4 = scalar_select %p1023_p10, 1, 0 }
  0x37   : > { %s590_s8 = sshll.u32 %s171_s22, 2  ;;  %p1030_p13 = pnand %p584_p6, %p143_p12 }
  0x38   : > { %s886_s10 = smov [#allocation2]   ;;  %s606_s19 = sshll.u32 %s876_s16, 6 }
  0x39   : > { %s1194_s9 = scalar_select %p1030_p13, 1, 0 }
  0x3a   : > { %s158_s11 = sshll.u32 %s886_s10, 4  ;;  %p634_p1 = pneg %p1030_p13  ;;  %s1034_s11 = int_to_ptr.vmem [resolvable:$true] %s158_s11 }
  0x3b   : > { %s1042_s23 = scalar_lea.hbm %s1181_s2, %s606_s19  ;;  %s194_s22 = scalar_lea.vmem [#allocation7], %s590_s8 }
  0x3c   : > { %s202_s25 = sshll.u32 %s194_s22, 4  ;;  %p1046_p0 = pnand %p634_p1, %p1183_p11  ;;  %s203_s25 = int_to_ptr.vmem [resolvable:$true] %s202_s25 }
  0x3d   : > { %s736_s27 = scalar_lea.hbm %s1042_s23, 64  ;;  %s741_s19 = scalar_lea.hbm %s1181_s2, 128 }
  0x3e   : > { %s1195_s26 = scalar_select %p1046_p0, 1, 0 }
  0x3f   : > { %p737_p3 = scmp.ne.s32.totalorder %s1042_s23, %s736_s27  ;;  %p742_p6 = scmp.lt.u32.totalorder %s1042_s23, %s1181_s2 }
  0x40   : > { %p743_p12 = scmp.lt.u32.totalorder %s741_s19, %s736_s27  ;;  %p745_p11 = scmp.lt.u32.totalorder %s736_s27, %s1042_s23 }
  0x41   : > { %p739_p2 = pnand %p737_p3, %p708_p9 }
  0x42   : > { %p744_p1 = por %p743_p12, %p742_p6 }
  0x43   : > { %p740_p4 = pneg %p739_p2 }
  0x44   : > { %p746_p10 = por %p745_p11, %p744_p1 }
  0x46   : > { %p747_p8 = pnand %p746_p10, %p740_p4 }
  0x48   : > { %750 = shalt.err (!%p747_p8)
}
  0x49   : > { %s751_s8 = scalar_lea.vmem %s203_s25, 64  ;;  %s887_s22 = smov [#allocation7]  }
  0x4a   : > { %p752_p5 = scmp.ne.s32.totalorder %s203_s25, %s751_s8  ;;  %s756_s6 = sshll.u32 %s887_s22, 4  ;;  %s757_s6 = int_to_ptr.vmem [resolvable:$false] %s756_s6 }
  0x4b   : > { %s758_s10 = scalar_lea.vmem %s757_s6, 128  ;;  %p759_p13 = scmp.lt.s32.totalorder %s203_s25, %s757_s6 }
  0x4c   : > { %p754_p3 = pnand %p752_p5, %p708_p9  ;;  %p760_p0 = scmp.lt.s32.totalorder %s758_s10, %s751_s8 }
  0x4e   : > { %p755_p2 = pneg %p754_p3  ;;  %p761_p6 = por %p760_p0, %p759_p13 }
  0x50   : > { %p762_p12 = pnand %p761_p6, %p755_p2 }
  0x52   : > { %765 = shalt.err (!%p762_p12)
}
  0x53   : > { %644 = dma.hbm_to_vmem [thread:$0]  (!%p967_p7), %s1042_s23, 64, %s203_s25, %s973_s5  }
  0x54   : > { %s766_s20 = scalar_lea.hbm %s1179_s0, 128  ;;  %p1196_p11 = scmp.ne.s32.totalorder %s1195_s26, 0 }
  0x55   : > { %p767_p9 = scmp.ne.s32.totalorder %s1179_s0, %s766_s20  ;;  %p773_p13 = scmp.lt.u32.totalorder %s766_s20, %s1179_s0 }
  0x56   : > { %p768_p5 = pneg %p1196_p11 }
  0x58   : > { %p769_p8 = pnand %p768_p5, %p767_p9 }
  0x5a   : > { %p770_p10 = pneg %p769_p8 }
  0x5c   : > { %p775_p0 = pnand %p773_p13, %p770_p10 }
  0x5e   : > { %778 = shalt.err (!%p775_p0)
}
  0x5f   : > { %s779_s29 = scalar_lea.vmem %s1034_s11, 128  ;;  %p787_p3 = scmp.lt.s32.totalorder %s1034_s11, %s1034_s11 }
  0x60   : > { %p780_p7 = scmp.ne.s32.totalorder %s1034_s11, %s779_s29  ;;  %p788_p2 = scmp.lt.s32.totalorder %s779_s29, %s779_s29 }
  0x62   : > { %p782_p4 = pnand %p780_p7, %p768_p5  ;;  %p789_p6 = por %p788_p2, %p787_p3 }
  0x64   : > { %p783_p1 = pneg %p782_p4 }
  0x66   : > { %p790_p12 = pnand %p789_p6, %p783_p1 }
  0x68   : > { %793 = shalt.err (!%p790_p12)
}
  0x69   : > { %637 = dma.hbm_to_vmem [thread:$0]  (!%p1196_p11), %s1179_s0, 128, %s1034_s11, [#allocation3]  }
  0x6a   : > { %p1197_p9 = scmp.ne.s32.totalorder %s1194_s9, 0 }
  0x6b   : > { %p1198_p8 = scmp.eq.s32.totalorder (!%p1197_p9), %s1002_s30, 0 }
  0x6c   : > { %211 = sbr.rel (%p1197_p9) target bundleno = 363 (0x16b), region = 32 }
  0x73   : > { %847 = dma.done.wait (%p1198_p8), [#allocation3], 128   ;;  %p1199_p5 = pmov %p1198_p8 }
  0x74   : > { %s217_s23 = sand.u32 1, %s1002_s30   ;;  %s1099_s25 = sand.u32 1, %s864_s13  }
  0x75   : > { %849 = vsyncadd (%p1199_p5), [#allocation3], 4294967168  ;;  %s595_s26 = sshll.u32 %s1099_s25, 7  ;;  %s218_s6 = scalar_lea.sflag [#allocation6], %s217_s23 }
  0x76   : > { %s1102_s10 = scalar_lea.vmem [#allocation5], %s595_s26  ;;  %p1200_p11 = scmp.ne.s32.totalorder %s1191_s7, 0 }
  0x78   : > { %851 = dma.done.wait (%p1200_p11), %s218_s6, 2112  }
  0x79   : > { %853 = vsyncadd (%p1200_p11), %s218_s6, 4294965184  ;;  %v888_v0 = vmov 0.0   ;;  %v263_v1 = vld [vmem:[%s1102_s10 + $0x8] sm:$0xff]  ;;  %v265_v3 = vld [vmem:[%s1102_s10 + $0x18] sm:$0xff]  ;;  %vm300_vm0 = vcmask 261120   ;;  %v280_v26 = vlaneseq  ;;  %s596_s30 = sshll.u32 %s1099_s25, 2 }
  0x7a   : > { %368 = vmatprep.mubr.f32.mxu0 %v888_v0  ;;  %439 = vmatprep.mubr.f32.mxu1 %v888_v0  ;;  %v267_v2 = vld [vmem:[%s1102_s10 + $0x28] sm:$0xff]  ;;  %v269_v5 = vld [vmem:[%s1102_s10 + $0x38] sm:$0xff]  ;;  %v262_v6 = vld [vmem:[%s1102_s10] sm:$0xff]  ;;  %s597_s7 = sshll.u32 %s1099_s25, 5  ;;  %s230_s9 = scalar_lea.vmem [#allocation7], %s596_s30 }
  0x7b   : > { %v608_v4 = vpack.c.bf16 %v267_v2, %v263_v1  ;;  %v266_v7 = vld [vmem:[%s1102_s10 + $0x20] sm:$0xff]  ;;  %v616_v8 = vpack.c.bf16 %v269_v5, %v265_v3  ;;  %v264_v10 = vld [vmem:[%s1102_s10 + $0x10] sm:$0xff]  ;;  %v271_v12 = vld [vmem:[%s1102_s10 + $0x48] sm:$0xff]  ;;  %v281_v27 = vshrl.u32 %v280_v26, 7  ;;  %s607_s11 = sshll.u32 %s872_s15, 9  ;;  %s257_s27 = scalar_lea.vmem [#allocation8], %s597_s7 }
  0x7c   : > { %v610_v9 = vpack.c.bf16 %v266_v7, %v262_v6  ;;  %v268_v11 = vld [vmem:[%s1102_s10 + $0x30] sm:$0xff]  ;;  %v275_v14 = vld [vmem:[%s1102_s10 + $0x68] sm:$0xff]  ;;  %v273_v15 = vld [vmem:[%s1102_s10 + $0x58] sm:$0xff]  ;;  %s467_s19 = sshll.u32 %s257_s27, 4  ;;  %s1130_s8 = scalar_lea.hbm %s1182_s3, %s607_s11  ;;  %s1132_s19 = int_to_ptr.vmem [resolvable:$true] %s467_s19 }
  0x7d   : > { %609 = vmatprep.subr.bf16.mxu0 %v608_v4  ;;  %v618_v13 = vpack.c.bf16 %v268_v11, %v264_v10  ;;  %v277_v16 = vld [vmem:[%s1102_s10 + $0x78] sm:$0xff]  ;;  %617 = vmatprep.subr.bf16.mxu1 %v616_v8  ;;  %v612_v17 = vpack.c.bf16 %v275_v14, %v271_v12  ;;  %v270_v19 = vld [vmem:[%s1102_s10 + $0x40] sm:$0xff]  ;;  %v272_v21 = vld [vmem:[%s1102_s10 + $0x50] sm:$0xff]  ;;  %v282_v28 = vsub.s32 0, %v281_v27  ;;  %v290_v30 = vsub.s32 2, %v281_v27  ;;  %s451_s15 = scalar_lea.sflag [#allocation4], %s1099_s25 }
  0x7e   : > { %611 = vmatpush1.bf16.msra.mxu0 %v610_v9  ;;  %v620_v18 = vpack.c.bf16 %v277_v16, %v273_v15  ;;  %v274_v20 = vld [vmem:[%s1102_s10 + $0x60] sm:$0xff]  ;;  %v276_v23 = vld [vmem:[%s1102_s10 + $0x70] sm:$0xff]  ;;  %v261_v25 = vld [vmem:[#allocation2] sm:$0xff]  ;;  %v286_v31 = vsub.s32 1, %v281_v27  ;;  %v294_v32 = vsub.s32 3, %v281_v27  ;;  %s794_s22 = scalar_lea.vmem %s1132_s19, 512 }
  0x7f   : > { %619 = vmatpush1.bf16.msra.mxu1 %v618_v13  ;;  %v614_v22 = vpack.c.bf16 %v274_v20, %v270_v19  ;;  %613 = vmatprep.subr.bf16.mxu0 %v612_v17  ;;  %v622_v24 = vpack.c.bf16 %v276_v23, %v272_v21  ;;  %v278_v29 = vld [vmem:[%s230_s9] sm:$0xf]  ;;  %p795_p10 = scmp.ne.s32.totalorder %s1132_s19, %s794_s22  ;;  %p1201_p13 = scmp.ne.s32.totalorder %s1192_s28, 0 }
  0x80   : > { %621 = vmatprep.subr.bf16.mxu1 %v620_v18  ;;  %v283_v33 = vrot.slane %v278_v29, %v282_v28  ;;  %v291_v34 = vrot.slane %v278_v29, %v290_v30  ;;  %v287_v35 = vrot.slane %v278_v29, %v286_v31  ;;  %v295_v36 = vrot.slane %v278_v29, %v294_v32  ;;  %s889_s29 = smov [#allocation8]  }
  0x81   : > { %p796_p0 = pnand %p795_p10, %p1201_p13  ;;  %s798_s1 = sshll.u32 %s889_s29, 4  ;;  %s799_s1 = int_to_ptr.vmem [resolvable:$false] %s798_s1 }
  0x82   : > { %615 = vmatpush1.bf16.msra.mxu0 %v614_v22  ;;  %s800_s5 = scalar_lea.vmem %s799_s1, 1024  ;;  %p801_p4 = scmp.lt.s32.totalorder %s1132_s19, %s799_s1 }
  0x83   : > { %623 = vmatpush1.bf16.msra.mxu1 %v622_v24  ;;  %p797_p7 = pneg %p796_p0  ;;  %p802_p1 = scmp.lt.s32.totalorder %s800_s5, %s794_s22 }
  0x85   : > { %598 = vmatmul.mubr.msk.f32.vlgmr.msra.gmra.mrb[0].mxu0 %vm300_vm0, %v261_v25  ;;  %p803_p3 = por %p802_p1, %p801_p4 }
  0x86   : > { %599 = vmatmul.mubr.msk.f32.vlgmr.msra.gmra.mrb[0].mxu1 %vm300_vm0, %v261_v25 }
  0x87   : > { %p804_p2 = pnand %p803_p3, %p797_p7 }
 0x158   : > { %v370_v37 = vpop.f32.mrb[0].mxu0 }
 0x159   : > { %v371_v38 = vadd.f32 %v370_v37, %v283_v33  ;;  %v441_v39 = vpop.f32.mrb[0].mxu1  ;;  %v372_v40 = vpop.f32.mrb[1].mxu0 }
 0x15a   : > { %v442_v41 = vadd.f32 %v441_v39, %v291_v34  ;;  %v373_v42 = vadd.f32 %v372_v40, %v287_v35  ;;  %v443_v43 = vpop.f32.mrb[1].mxu1 }
 0x15b   : > { %446 = vst [vmem:[%s257_s27] sm:$0xff] %v371_v38  ;;  %v444_v44 = vadd.f32 %v443_v43, %v295_v36 }
 0x15c   : > { %448 = vst [vmem:[%s257_s27 + $0x10] sm:$0xff] %v442_v41  ;;  %447 = vst [vmem:[%s257_s27 + $0x8] sm:$0xff] %v373_v42 }
 0x15d   : > { %449 = vst [vmem:[%s257_s27 + $0x18] sm:$0xff] %v444_v44 }
 0x15e   : > { %807 = shalt.err (!%p804_p2)
}
 0x15f   : > { %s808_s23 = scalar_lea.hbm %s1130_s8, 512  ;;  %s812_s6 = scalar_lea.hbm %s1182_s3, 1024 }
 0x160   : > { %p809_p6 = scmp.ne.s32.totalorder %s1130_s8, %s808_s23  ;;  %p813_p8 = scmp.lt.u32.totalorder %s1130_s8, %s1182_s3 }
 0x161   : > { %p814_p5 = scmp.lt.u32.totalorder %s812_s6, %s808_s23  ;;  %p816_p10 = scmp.lt.u32.totalorder %s808_s23, %s1130_s8 }
 0x162   : > { %p810_p12 = pnand %p809_p6, %p1201_p13 }
 0x163   : > { %p815_p11 = por %p814_p5, %p813_p8 }
 0x164   : > { %p811_p9 = pneg %p810_p12 }
 0x165   : > { %p817_p0 = por %p816_p10, %p815_p11 }
 0x167   : > { %p818_p7 = pnand %p817_p0, %p811_p9 }
 0x169   : > { %821 = shalt.err (!%p818_p7)
}
 0x16a   : > { %632 = dma.vmem_to_hbm [thread:$0]  (%p1201_p13), %s1132_s19, 512, %s1130_s8, %s451_s15  }
 0x16b PF: > { %s479_s7 = sand.u32 1, %s860_s12   ;;  %p1202_p4 = scmp.ne.s32.totalorder %s1193_s4, 0 }
 0x16c   : > { %p1203_p1 = scmp.ge.s32.totalorder %s880_s17, 2  ;;  %s480_s9 = scalar_lea.sflag [#allocation4], %s479_s7 }
 0x16e   : > { %p646_p3 = pnand %p1203_p1, %p1202_p4 }
 0x170   : > { %855 = dma.done.wait (!%p646_p3), %s480_s9, 512  }
 0x171   : > { %857 = vsyncadd (!%p646_p3), %s480_s9, 4294966784  ;;  %s20_s17 = sadd.s32 1, %s880_s17   ;;  %s1204_s12 = smov %s864_s13 }
 0x172   : > { %p17_p2 = scmp.ge.s32.totalorder %s20_s17, 4   ;;  %s1205_s13 = smov %s868_s14 }
 0x173   : > { %s1206_s14 = smov %s958_s24  ;;  %s1207_s15 = smov %s876_s16 }
 0x174   : > { %s1208_s16 = smov %s1210_s18  ;;  %19 = sbr.rel (!%p17_p2) target bundleno = 9 (0x9), region = 94 }
 0x17b   :  { %485 = vsyncpa [#allocation3], 1 }
 0x17c   :  { %487 = vsyncpa [#allocation3 + $0x1], 1 }
 0x17d   :  { %488 = vsyncpa [#allocation6], 1 }
 0x17e   :  { %490 = vsyncpa [#allocation6 + $0x1], 1 }
 0x17f   :  { %491 = vsyncpa [#allocation4], 1 }
 0x180   :  { %493 = vsyncpa [#allocation4 + $0x1], 1 }

</bundles_post_ra>
